<compile_context>
chip_gen: v6e
topology: v6e:2x2x1
jax: 0.10.0
libtpu: 0.0.40
codegen_flags: <defaults>
</compile_context>

<pallas_src>
import functools

import jax
import jax.numpy as jnp
from jax.experimental import pallas as pl
from jax.experimental.pallas import tpu as pltpu

_LANES = 128


def _balanced_loss_tile_kernel(x_ref, t_ref, out_ref, *,
                               gamma, n_rows, tile_rows, num_classes, lout):
    pid = pl.program_id(0)
    x = x_ref[...].astype(jnp.float32)          # (TN, C) logits, f32 compute
    t = t_ref[...]                              # (TN, 1) int32 targets
    TN, C = x.shape

    # Valid-row mask for the ragged last tile; fold it into the target id so the
    # one-hot / histogram compares need no extra logical_and over full-width arrays.
    row = pid * tile_rows + jax.lax.broadcasted_iota(jnp.int32, (TN, 1), 0)
    valid = row < n_rows                                      # (TN, 1) bool
    t_eff = jnp.where(valid, t, -1)                           # invalid rows hit no class

    # One-hot target mask (bool; no f32 mask array).
    col = jax.lax.broadcasted_iota(jnp.int32, (TN, C), 1)
    mask = col == t_eff                                       # (TN, C) bool

    # log p_t via log-sum-exp; x - m is computed once and reused for x_t.
    m = jnp.max(x, axis=1, keepdims=True)                     # (TN, 1)  XLU
    xm = x - m                                                # (TN, C)
    s = jnp.sum(jnp.exp(xm), axis=1, keepdims=True)           # (TN, 1)  EUP + XLU
    xt_m = jnp.sum(jnp.where(mask, xm, 0.0), axis=1, keepdims=True)   # x_t - m
    log_p = xt_m - jnp.log(s)                                 # (TN, 1)
    p = jnp.exp(log_p)                                        # p_t

    # focal term f_i = -(1 - p_i)^gamma * log(p_i)   (gamma static -> integer_pow)
    f = -((1.0 - p) ** gamma) * log_p
    f = jnp.where(valid, f, 0.0)                              # NaN-safe select on (TN, 1)
    sum_f = jnp.sum(f)

    # Merged lane-dense output row: class histogram in lanes [0, C), sum_f in lane C.
    lane = jax.lax.broadcasted_iota(jnp.int32, (1, lout), 1)  # (1, Lout)
    hit = (t_eff == lane).astype(jnp.float32)                 # (TN, Lout); same vreg cost as (TN, C)
    counts_row = jnp.sum(hit, axis=0, keepdims=True)          # (1, Lout)
    out_row = counts_row + jnp.where(lane == num_classes, sum_f, 0.0)
    out_ref[...] = out_row.reshape(1, 1, lout)


def _pick_row_tile(n, c, itemsize, vmem_limit_bytes):
    """Largest row tile whose padded live set fits the scoped VMEM limit.

    Per row of the tile (all widths padded to 128 lanes in VMEM):
      * 2 double-buffered native-dtype input rows:        2 * c_pad * itemsize
      * ~4 f32-sized temporaries (f32 copy, x-m, exp,
        where-select / histogram compare):                4 * c_pad * 4
      * 2 double-buffered lane-padded int32 target rows:  2 * 128 * 4
    """
    c_pad = pl.cdiv(c, _LANES) * _LANES
    per_row = 2 * c_pad * max(int(itemsize), 1) + 4 * c_pad * 4 + 2 * _LANES * 4
    budget = vmem_limit_bytes - (4 << 20)          # headroom for outputs / semaphores
    tn = budget // per_row
    tn = int(max(8, min(tn, 32768)))
    tn = (tn // 8) * 8
    return n if tn >= n else tn


def balanced_loss(inputs, targets, *, gamma=2, size_average=True, tile_rows=None):
    """inputs: (N, C) float logits; targets: (N,) int class ids. Returns scalar loss."""
    N, C = inputs.shape
    itemsize = jnp.dtype(inputs.dtype).itemsize
    t2d = targets.astype(jnp.int32).reshape(N, 1)

    vmem_limit = 32 * 1024 * 1024                  # safe on v5e/v6e and v7x (64 MiB phys)
    if tile_rows is None:
        tile_rows = _pick_row_tile(N, C, itemsize, vmem_limit)
    tn = tile_rows
    num_tiles = pl.cdiv(N, tn)

    # Merged output row width: counts lanes [0, C) + one lane for sum_f, padded to 128.
    lout = pl.cdiv(C + 1, _LANES) * _LANES

    kernel = functools.partial(
        _balanced_loss_tile_kernel,
        gamma=gamma, n_rows=N, tile_rows=tn, num_classes=C, lout=lout)

    cost = pl.CostEstimate(
        flops=int(8 * N * C),
        transcendentals=int(N * C + 3 * N),
        bytes_accessed=int(N * C * itemsize + N * 4 + num_tiles * lout * 4),
    )

    partials = pl.pallas_call(
        kernel,
        out_shape=jax.ShapeDtypeStruct((num_tiles, 1, lout), jnp.float32),
        grid_spec=pltpu.PrefetchScalarGridSpec(
            num_scalar_prefetch=0,
            grid=(num_tiles,),
            in_specs=(
                pl.BlockSpec((tn, C), lambda i: (i, 0)),   # native-dtype logits tile
                pl.BlockSpec((tn, 1), lambda i: (i, 0)),   # int32 targets tile
            ),
            out_specs=pl.BlockSpec((1, 1, lout), lambda i: (i, 0, 0)),
        ),
        compiler_params=pltpu.CompilerParams(
            # Row tiles are fully independent -> pipelined everywhere, 2-TC shard on v7x.
            dimension_semantics=("parallel",),
            vmem_limit_bytes=vmem_limit,
        ),
        cost_estimate=cost,
    )(inputs, t2d)

    # Tiny O(num_tiles * Lout) finalize in plain XLA (global histogram must be complete
    # before alpha is formed, so this cannot fold into the per-tile pass).
    partials = partials.reshape(num_tiles, lout)
    counts = jnp.sum(partials[:, :C], axis=0)                 # global histogram (C,)
    sum_f = jnp.sum(partials[:, C])                           # sum_i f_i
    n_f = jnp.float32(N)
    # sum_j alpha_c[j] = sum_c counts[c] * (1 - counts[c]/(10N)) = N - sum_c counts[c]^2/(10N)
    sum_a = n_f - jnp.sum(counts * counts) / (10.0 * n_f)
    total = sum_f * sum_a
    return total / (n_f * n_f) if size_average else total


def balanced_loss_ref(inputs, targets, gamma=2, size_average=True):
    """Pure-JAX reference reproducing the PyTorch forward (incl. the (N, N) broadcast)."""
    N, C = inputs.shape
    P = jax.nn.softmax(inputs.astype(jnp.float32), axis=1)
    mask = jax.nn.one_hot(targets, C, dtype=jnp.float32)
    counts = jnp.sum(mask, axis=0)
    alpha = 1.0 - (counts / N) / 10.0                             # (C,)
    alpha_c = alpha[targets]                                      # (N,)
    probs = jnp.sum(P * mask, axis=1, keepdims=True)              # (N, 1)
    log_p = jnp.log(probs)
    batch_loss = -alpha_c[None, :] * ((1.0 - probs) ** gamma) * log_p   # (N, N) quirk
    return jnp.mean(batch_loss) if size_average else jnp.sum(batch_loss)


if __name__ == "__main__":
    key = jax.random.PRNGKey(0)
    k1, k2, k3, k4 = jax.random.split(key, 4)

    # Case 1: tiny shape implied by the module (N=8 samples, C=4 classes), single tile.
    N, C = 8, 4
    x = jax.random.normal(k1, (N, C), dtype=jnp.float32)
    t = jax.random.randint(k2, (N,), 0, C, dtype=jnp.int32)
    loss = balanced_loss(x, t, gamma=2, size_average=True)
    jax.block_until_ready(loss)
    ref = balanced_loss_ref(x, t, gamma=2, size_average=True)
    assert jnp.allclose(loss, ref, rtol=1e-4, atol=1e-6), (loss, ref)

    # Case 2: exercise the row-tile grid, the ragged last tile and the merged
    # lane-dense output path (N=200 with a forced 64-row tile -> 4 tiles).
    N2, C2 = 200, 4
    x2 = jax.random.normal(k3, (N2, C2), dtype=jnp.float32)
    t2 = jax.random.randint(k4, (N2,), 0, C2, dtype=jnp.int32)
    loss2 = balanced_loss(x2, t2, gamma=2, size_average=False, tile_rows=64)
    jax.block_until_ready(loss2)
    ref2 = balanced_loss_ref(x2, t2, gamma=2, size_average=False)
    assert jnp.allclose(loss2, ref2, rtol=1e-4, atol=1e-4), (loss2, ref2)

    # Case 3: auto-picked tile (exercises the padding/temporary-aware VMEM budget).
    loss3 = balanced_loss(x2, t2, gamma=2, size_average=True)
    jax.block_until_ready(loss3)
    ref3 = balanced_loss_ref(x2, t2, gamma=2, size_average=True)
    assert jnp.allclose(loss3, ref3, rtol=1e-4, atol=1e-6), (loss3, ref3)

    print("KERNEL_OK")
</pallas_src>

<mosaic_0001>
module attributes {stable_mosaic.version = 11 : i64} {
  func.func @_balanced_loss_tile_kernel(%arg0: i32, %arg1: memref<8x4xf32, #tpu.memory_space<vmem>>, %arg2: memref<8x1xi32, #tpu.memory_space<vmem>>, %arg3: memref<1x1x128xf32, #tpu.memory_space<vmem>>) attributes {dimension_semantics = [#tpu.dimension_semantics<parallel>], iteration_bounds = array<i64: 1>, scalar_prefetch = 0 : i64, scratch_operands = 0 : i64, tpu.core_type = #tpu.core_type<tc>, window_params = [{transform_indices = @transform_0, window_bounds = array<i64: 8, 4>}, {transform_indices = @transform_1, window_bounds = array<i64: 8, 1>}, {transform_indices = @transform_2, window_bounds = array<i64: 1, 1, 128>}]} {
    %c0 = arith.constant 0 : index
    %c0_0 = arith.constant 0 : index
    %0 = vector.load %arg1[%c0, %c0_0] : memref<8x4xf32, #tpu.memory_space<vmem>>, vector<8x4xf32>
    %c0_1 = arith.constant 0 : index
    %c0_2 = arith.constant 0 : index
    %1 = vector.load %arg2[%c0_1, %c0_2] : memref<8x1xi32, #tpu.memory_space<vmem>>, vector<8x1xi32>
    %c8_i32 = arith.constant 8 : i32
    %2 = arith.muli %arg0, %c8_i32 : i32
    %3 = tpu.iota {dimensions = array<i32: 0>} : vector<8x1xi32>
    %4 = vector.broadcast %2 : i32 to vector<8x1xi32>
    %5 = arith.addi %4, %3 : vector<8x1xi32>
    %c8_i32_3 = arith.constant 8 : i32
    %6 = vector.broadcast %c8_i32_3 : i32 to vector<8x1xi32>
    %7 = arith.cmpi slt, %5, %6 : vector<8x1xi32>
    %c-1_i32 = arith.constant -1 : i32
    %8 = vector.broadcast %c-1_i32 : i32 to vector<8x1xi32>
    %9 = arith.select %7, %1, %8 : vector<8x1xi1>, vector<8x1xi32>
    %10 = tpu.iota {dimensions = array<i32: 1>} : vector<8x4xi32>
    %11 = vector.broadcast %9 : vector<8x1xi32> to vector<8x4xi32>
    %12 = arith.cmpi eq, %10, %11 : vector<8x4xi32>
    %cst = arith.constant dense<0xFF800000> : vector<8xf32>
    %13 = vector.multi_reduction <maximumf>, %0, %cst [1] : vector<8x4xf32> to vector<8xf32>
    %14 = vector.shape_cast %13 : vector<8xf32> to vector<8x1xf32>
    %15 = vector.broadcast %14 : vector<8x1xf32> to vector<8x4xf32>
    %16 = arith.subf %0, %15 : vector<8x4xf32>
    %17 = math.exp %16 : vector<8x4xf32>
    %cst_4 = arith.constant dense<0.000000e+00> : vector<8xf32>
    %18 = vector.multi_reduction <add>, %17, %cst_4 [1] : vector<8x4xf32> to vector<8xf32>
    %19 = vector.shape_cast %18 : vector<8xf32> to vector<8x1xf32>
    %cst_5 = arith.constant 0.000000e+00 : f32
    %20 = vector.broadcast %cst_5 : f32 to vector<8x4xf32>
    %21 = arith.select %12, %16, %20 : vector<8x4xi1>, vector<8x4xf32>
    %cst_6 = arith.constant dense<0.000000e+00> : vector<8xf32>
    %22 = vector.multi_reduction <add>, %21, %cst_6 [1] : vector<8x4xf32> to vector<8xf32>
    %23 = vector.shape_cast %22 : vector<8xf32> to vector<8x1xf32>
    %24 = math.log %19 : vector<8x1xf32>
    %25 = arith.subf %23, %24 : vector<8x1xf32>
    %26 = math.exp %25 : vector<8x1xf32>
    %cst_7 = arith.constant 1.000000e+00 : f32
    %27 = vector.broadcast %cst_7 : f32 to vector<8x1xf32>
    %28 = arith.subf %27, %26 : vector<8x1xf32>
    %29 = arith.mulf %28, %28 : vector<8x1xf32>
    %cst_8 = arith.constant 0.000000e+00 : f32
    %30 = vector.broadcast %cst_8 : f32 to vector<8x1xf32>
    %31 = arith.subf %30, %29 : vector<8x1xf32>
    %32 = arith.mulf %31, %25 : vector<8x1xf32>
    %cst_9 = arith.constant 0.000000e+00 : f32
    %33 = vector.broadcast %cst_9 : f32 to vector<8x1xf32>
    %34 = arith.select %7, %32, %33 : vector<8x1xi1>, vector<8x1xf32>
    %35 = vector.shape_cast %34 : vector<8x1xf32> to vector<1x8x1xf32>
    %cst_10 = arith.constant dense<0.000000e+00> : vector<1xf32>
    %36 = vector.multi_reduction <add>, %35, %cst_10 [1, 2] : vector<1x8x1xf32> to vector<1xf32>
    %37 = vector.shape_cast %36 : vector<1xf32> to vector<1x1x1xf32>
    %38 = vector.extract %37[0, 0, 0] : f32 from vector<1x1x1xf32>
    %39 = tpu.iota {dimensions = array<i32: 1>} : vector<1x128xi32>
    %40 = vector.broadcast %9 : vector<8x1xi32> to vector<8x128xi32>
    %41 = vector.broadcast %39 : vector<1x128xi32> to vector<8x128xi32>
    %42 = arith.cmpi eq, %40, %41 : vector<8x128xi32>
    %43 = arith.extui %42 : vector<8x128xi1> to vector<8x128xi32>
    %44 = arith.sitofp %43 : vector<8x128xi32> to vector<8x128xf32>
    %cst_11 = arith.constant dense<0.000000e+00> : vector<128xf32>
    %45 = vector.multi_reduction <add>, %44, %cst_11 [0] : vector<8x128xf32> to vector<128xf32>
    %46 = vector.shape_cast %45 : vector<128xf32> to vector<1x128xf32>
    %c4_i32 = arith.constant 4 : i32
    %47 = vector.broadcast %c4_i32 : i32 to vector<1x128xi32>
    %48 = arith.cmpi eq, %39, %47 : vector<1x128xi32>
    %cst_12 = arith.constant 0.000000e+00 : f32
    %49 = vector.broadcast %38 : f32 to vector<1x128xf32>
    %50 = vector.broadcast %cst_12 : f32 to vector<1x128xf32>
    %51 = arith.select %48, %49, %50 : vector<1x128xi1>, vector<1x128xf32>
    %52 = arith.addf %46, %51 : vector<1x128xf32>
    %53 = vector.shape_cast %52 : vector<1x128xf32> to vector<1x1x128xf32>
    %c0_13 = arith.constant 0 : index
    %c0_14 = arith.constant 0 : index
    %c0_15 = arith.constant 0 : index
    %54 = vector.load %arg3[%c0_13, %c0_14, %c0_15] : memref<1x1x128xf32, #tpu.memory_space<vmem>>, vector<1x1x128xf32>
    tpu.vector_store %arg3[%c0_13, %c0_14, %c0_15], %53 {strides = array<i32>} : memref<1x1x128xf32, #tpu.memory_space<vmem>>, vector<1x1x128xf32>,
    return
  }
  func.func @transform_0(%arg0: i32) -> (i32, i32) {
    %c0_i32 = arith.constant 0 : i32
    %c0_i32_0 = arith.constant 0 : i32
    return %arg0, %c0_i32 : i32, i32
  }
  func.func @transform_1(%arg0: i32) -> (i32, i32) {
    %c0_i32 = arith.constant 0 : i32
    %c0_i32_0 = arith.constant 0 : i32
    return %arg0, %c0_i32 : i32, i32
  }
  func.func @transform_2(%arg0: i32) -> (i32, i32, i32) {
    %c0_i32 = arith.constant 0 : i32
    %c0_i32_0 = arith.constant 0 : i32
    %c0_i32_1 = arith.constant 0 : i32
    return %arg0, %c0_i32, %c0_i32_0 : i32, i32, i32
  }
}

</mosaic_0001>

<bundles_post_ra>
// kernel: tpu_custom_call.1
= control target key start
LH: loop header
LB: loop body
LE: loop exit
PB: predicated region body
PF: predicated region fallthrough
CT: control target
= control target key end

     0   :  { %vm27_vm0 = vcmask 31744   ;;  %s155_s0 = inlined_call_operand.vmem [shape: f32[8,4], index: 0, kind: input, shape index: {}]   ;;  %s156_s1 = inlined_call_operand.vmem [shape: s32[8,1], index: 1, kind: input, shape index: {}]   ;;  %s157_s2 = inlined_call_operand.hbm [shape: f32[1,1,128], index: 2, kind: output, shape index: {}]  }
   0x1   :  { %v12_v0 = vld [vmem:[%s155_s0] sm:$0xff] }
   0x2   :  { %7 = vsyncpa [#allocation3], 0  ;;  %v28_v1 = vsel %vm27_vm0, %v12_v0, -inf  ;;  %v125_v2 = vmov 0   ;;  %v13_v3 = vld [vmem:[%s156_s1] sm:$0xff]  ;;  %v21_v7 = vlaneseq  ;;  %vm51_vm2 = vcmask 7168  }
   0x3   :  { %96 = vset.pattern.permute.xlu0 %v125_v2  ;;  %v126_v33 = vmov 0.0   ;;  %s127_s1 = smov [#allocation2]  }
   0x4   :  { %29 = vmax.xlane.f32.xlu0 %v28_v1  ;;  %v22_v8 = vand.u32 127, %v21_v7  ;;  %s82_s13 = sshll.u32 %s127_s1, 4  ;;  %s83_s13 = int_to_ptr.vmem [resolvable:$true] %s82_s13 }
   0x5   :  { %s103_s14 = scalar_lea.vmem %s83_s13, 16  ;;  %s107_s15 = scalar_lea.vmem %s83_s13, 32 }
   0x6   :  { %vm71_vm4 = vcmp.eq.s32.totalorder %v22_v8, 4  ;;  %p104_p0 = scmp.ne.s32.totalorder %s83_s13, %s103_s14  ;;  %p108_p1 = scmp.lt.s32.totalorder %s83_s13, %s83_s13 }
   0x7   :  { %p109_p2 = scmp.lt.s32.totalorder %s107_s15, %s103_s14 }
   0x9   :  { %p110_p3 = por %p109_p2, %p108_p1 }
   0xb   :  { %p111_p4 = pnand %p110_p3, %p104_p0 }
  0x1a   :  { %24 = vperm.xlu0 %96, %v13_v3  }
  0x8d   :  { %v30_v4 = vpop.xlane.xlu0 %29 }
  0x8e   :  { %v31_v5 = vsub.f32 %v12_v0, %v30_v4 }
  0x90   :  { %v32_v6 = vmul.f32 1.442695, %v31_v5 }
  0x92   :  { %97 = vpow2.f32 %v32_v6 }
  0x95   :  { %v25_v9 = vpop.permute.xlu0 %24 }
  0x96   :  { %vm26_vm1 = vcmp.eq.s32.totalorder %v22_v8, %v25_v9  ;;  %vm62_vm3 = vcmp.eq.s32.totalorder %v25_v9, %v22_v8 }
  0x97   :  { %v37_v12 = vsel %vm26_vm1, %v31_v5, 0.0  ;;  %v90_v34 = vsel %vm62_vm3, 1.0, %v126_v33 }
  0x98   :  { %v38_v13 = vsel %vm27_vm0, %v37_v12, 0.0  ;;  %v65_v35 = vrot.slane %v90_v34, 4 }
  0x9a   :  { %v66_v36 = vadd.f32 %v90_v34, %v65_v35 }
  0x9c   :  { %v67_v37 = vrot.slane %v66_v36, 2 }
  0x9e   :  { %v68_v38 = vadd.f32 %v67_v37, %v66_v36 }
  0x9f   :  { %v98_v10 = vpop.eup %97 }
  0xa0   :  { %v34_v11 = vsel %vm27_vm0, %v98_v10, 0.0  ;;  %v69_v39 = vrot.slane %v68_v38, 1 }
  0xa1   :  { %35 = vadd.xlane.f32.xlu1 %v34_v11 }
  0xa2   :  { %v70_v40 = vadd.f32 %v69_v39, %v68_v38 }
  0xa5   :  { %39 = vadd.xlane.f32.xlu1 %v38_v13 }
 0x12a   :  { %v36_v14 = vpop.xlane.xlu1 %35 }
 0x12b   :  { %99 = vlog2.f32 %v36_v14 }
 0x12e   :  { %v40_v17 = vpop.xlane.xlu1 %39 }
 0x138   :  { %v100_v15 = vpop.eup %99 }
 0x139   :  { %v42_v16 = vmul.f32 0.6931472, %v100_v15 }
 0x13b   :  { %v43_v18 = vsub.f32 %v40_v17, %v42_v16 }
 0x13d   :  { %v44_v19 = vmul.f32 1.442695, %v43_v18 }
 0x13f   :  { %101 = vpow2.f32 %v44_v19 }
 0x14c   :  { %v102_v20 = vpop.eup %101 }
 0x14d   :  { %v46_v21 = vsub.f32 1.0, %v102_v20 }
 0x14f   :  { %v47_v22 = vmul.f32 %v46_v21, %v46_v21 }
 0x151   :  { %v48_v23 = vsub.f32 0.0, %v47_v22 }
 0x153   :  { %v49_v24 = vmul.f32 %v48_v23, %v43_v18 }
 0x155   :  { %v52_v25 = vsel %vm51_vm2, %v49_v24, 0.0 }
 0x156   :  { %53 = vadd.xlane.f32.xlu1 %v52_v25 }
 0x1df   :  { %v54_v26 = vpop.xlane.xlu1 %53 }
 0x1e0   :  { %v55_v27 = vrot.slane %v54_v26, 4 }
 0x1e2   :  { %v56_v28 = vadd.f32 %v55_v27, %v54_v26 }
 0x1e4   :  { %v57_v29 = vrot.slane %v56_v28, 2 }
 0x1e6   :  { %v58_v30 = vadd.f32 %v57_v29, %v56_v28 }
 0x1e8   :  { %v59_v31 = vrot.slane %v58_v30, 1 }
 0x1ea   :  { %v60_v32 = vadd.f32 %v59_v31, %v58_v30 }
 0x1ec   :  { %91 = vpush %v60_v32 }
 0x21d   :  { %s92_s0 = spop %91 }
 0x21e   :  { %v72_v41 = vstv %s92_s0 }
 0x21f   :  { %v73_v42 = vsel %vm71_vm4, %v72_v41, 0.0 }
 0x220   :  { %v74_v43 = vadd.f32 %v73_v42, %v70_v40 }
 0x222   :  { %75 = vst [vmem:[#allocation2] sm:$0x1] %v74_v43 }
 0x223   :  { %114 = shalt.err (!%p111_p4)
}
 0x224   :  { %85 = dma.vmem_to_hbm [thread:$0]  %s83_s13, 16, %s157_s2, [#allocation3]  }
 0x225   :  { %123 = dma.done.wait [#allocation3], 16  }
 0x226   :  { %124 = vsyncadd [#allocation3], 4294967280 }
 0x227   :  { %89 = vsyncpa [#allocation3], 1 }

</bundles_post_ra>
